<compile_context>
chip_gen: v7x
topology: tpu7x:2x2x1
jax: 0.10.0
libtpu: 0.0.40
codegen_flags: <defaults>
</compile_context>

<pallas_src>
import functools

import jax
import jax.numpy as jnp
import numpy as np
from jax.experimental import pallas as pl
from jax.experimental.pallas import tpu as pltpu


def _round_up(n, m):
    return ((n + m - 1) // m) * m


def _timenet_kernel(xt_ref, *rest, num_layers, skips, input_ch):
    """One batch-tile of the TimeNetRegression forward pass."""
    out_ref = rest[-1]            # (tile_n, 3) f32
    refs = rest[:-1]              # flat weight/bias refs (resident in VMEM)

    # Fused [new_pts, t] tile; cast once to bf16 for the MXU.
    xt = xt_ref[...].astype(jnp.bfloat16)          # (tile_n, in_ch + in_ch_t)
    x = xt[:, :input_ch]                           # new_pts part (skip layers)

    p = 0
    # Layer 0: cat([x, t]) @ W0 + b0  (single matmul on the fused input).
    w0 = refs[p][...]                              # bf16
    b0 = refs[p + 1][...]                          # f32
    p += 2
    h = jnp.dot(xt, w0, preferred_element_type=jnp.float32) + b0
    h = jnp.maximum(h, 0.0)                        # f32

    for i in range(1, num_layers):
        if (i - 1) in skips:
            # Previous layer's output was cat([x, h]) -> split matmul instead
            # of a lane-axis concatenation.
            wx = refs[p][...]
            wh = refs[p + 1][...]
            b = refs[p + 2][...]
            p += 3
            h = (jnp.dot(x, wx, preferred_element_type=jnp.float32)
                 + jnp.dot(h.astype(jnp.bfloat16), wh,
                           preferred_element_type=jnp.float32)
                 + b)
        else:
            wh = refs[p][...]
            b = refs[p + 1][...]
            p += 2
            h = jnp.dot(h.astype(jnp.bfloat16), wh,
                        preferred_element_type=jnp.float32) + b
        h = jnp.maximum(h, 0.0)

    wo = refs[p][...]
    bo = refs[p + 1][...]
    out = jnp.dot(h.astype(jnp.bfloat16), wo,
                  preferred_element_type=jnp.float32) + bo
    out_ref[...] = out.astype(out_ref.dtype)


def timenet_regression(x, t, params, *, tile_n=4096,
                       vmem_limit_bytes=48 * 1024 * 1024):
    """Run the TimeNetRegression forward pass.

    params: dict with
      'skips' : tuple of skip layer indices (same meaning as the torch module)
      'layers': list (len num_layers) of dicts:
         layer 0                     : {'w': (input_ch + input_ch_time, H), 'b': (1, H)}
         layer i>0, (i-1) in skips   : {'w_x': (input_ch, H), 'w_h': (H, H), 'b': (1, H)}
         layer i>0 otherwise         : {'w_h': (H, H), 'b': (1, H)}
      'out'   : {'w': (H, 3), 'b': (1, 3)}
    (To load a torch checkpoint: w = W.T; for skip layers w_x = W.T[:input_ch],
     w_h = W.T[input_ch:].)
    """
    skips = tuple(sorted(params["skips"]))
    layers = params["layers"]
    num_layers = len(layers)
    assert all(0 <= s <= num_layers - 2 for s in skips), (
        "a skip on the final layer would break _time_out (as in the torch module)")

    n, input_ch = x.shape
    _, input_ch_time = t.shape
    in_feat = input_ch + input_ch_time

    # Fuse the two input streams into one HBM array (one BlockSpec / DMA per
    # step instead of two, and a single layer-0 matmul).
    xt = jnp.concatenate([x.astype(jnp.float32), t.astype(jnp.float32)],
                         axis=-1)

    # Pre-cast MXU operands (weights) to bf16 on the HBM side; biases stay f32
    # so the bias add / ReLU run in the f32 accumulator.
    def wmat(a):
        return a.astype(jnp.bfloat16)

    def bias(a):
        return a.astype(jnp.float32)

    flat = [wmat(layers[0]["w"]), bias(layers[0]["b"])]
    for i in range(1, num_layers):
        if (i - 1) in skips:
            flat += [wmat(layers[i]["w_x"]), wmat(layers[i]["w_h"]),
                     bias(layers[i]["b"])]
        else:
            flat += [wmat(layers[i]["w_h"]), bias(layers[i]["b"])]
    flat += [wmat(params["out"]["w"]), bias(params["out"]["b"])]

    # Batch tiling: multiples of 8 sublanes.  Default 4096 rows per grid step
    # (amortizes per-step overhead; comfortably under the vmem limit below).
    n_min = _round_up(n, 8)
    tile_n = _round_up(max(8, min(tile_n, n_min)), 8)
    # v7x has 2 TensorCores sharing the "parallel" grid axis: make sure big
    # batches give at least 2 grid steps so neither core sits idle.
    if n_min >= 512:
        tile_n = min(tile_n, _round_up(pl.cdiv(n_min, 2), 8))
    n_pad = _round_up(n, tile_n)
    if n_pad != n:
        xt = jnp.pad(xt, ((0, n_pad - n), (0, 0)))
    grid = (n_pad // tile_n,)

    def resident_spec(a):
        # Full-array block, constant index map -> DMA'd once, stays in VMEM.
        return pl.BlockSpec(a.shape, lambda i: (0, 0))

    kernel = functools.partial(_timenet_kernel, num_layers=num_layers,
                               skips=skips, input_ch=input_ch)

    out = pl.pallas_call(
        kernel,
        out_shape=jax.ShapeDtypeStruct((n_pad, 3), jnp.float32),
        grid_spec=pltpu.PrefetchScalarGridSpec(
            num_scalar_prefetch=0,
            grid=grid,
            in_specs=[pl.BlockSpec((tile_n, in_feat), lambda i: (i, 0))]
                     + [resident_spec(a) for a in flat],
            out_specs=pl.BlockSpec((tile_n, 3), lambda i: (i, 0)),
        ),
        compiler_params=pltpu.CompilerParams(
            dimension_semantics=("parallel",),
            vmem_limit_bytes=vmem_limit_bytes),
    )(xt, *flat)
    return out[:n]


def init_params(key, input_ch, input_ch_time, hidden_dim, num_layers, skips):
    """Random f32 params in the layout expected by timenet_regression."""
    skips = tuple(sorted(skips))
    keys = jax.random.split(key, num_layers + 1)

    def linear(k, in_f, out_f):
        kw, kb = jax.random.split(k)
        lim = 1.0 / float(np.sqrt(in_f))
        w = jax.random.uniform(kw, (in_f, out_f), jnp.float32, -lim, lim)
        b = jax.random.uniform(kb, (1, out_f), jnp.float32, -lim, lim)
        return w, b

    layers = []
    w, b = linear(keys[0], input_ch + input_ch_time, hidden_dim)
    layers.append({"w": w, "b": b})
    for i in range(1, num_layers):
        if (i - 1) in skips:
            w, b = linear(keys[i], input_ch + hidden_dim, hidden_dim)
            layers.append({"w_x": w[:input_ch], "w_h": w[input_ch:], "b": b})
        else:
            w, b = linear(keys[i], hidden_dim, hidden_dim)
            layers.append({"w_h": w, "b": b})
    wo, bo = linear(keys[num_layers], hidden_dim, 3)
    return {"layers": layers, "out": {"w": wo, "b": bo}, "skips": skips}


def reference_forward(x, t, params):
    """Pure-JAX f32 reference matching the torch forward (cat-based)."""
    skips = set(params["skips"])
    hp = jax.lax.Precision.HIGHEST
    h = jnp.concatenate([x, t], axis=-1)
    for i, lp in enumerate(params["layers"]):
        if i == 0:
            w = lp["w"]
        elif (i - 1) in skips:
            w = jnp.concatenate([lp["w_x"], lp["w_h"]], axis=0)
        else:
            w = lp["w_h"]
        h = jnp.maximum(jnp.dot(h, w, precision=hp) + lp["b"], 0.0)
        if i in skips:
            h = jnp.concatenate([x, h], axis=-1)
    return jnp.dot(h, params["out"]["w"], precision=hp) + params["out"]["b"]


if __name__ == "__main__":
    input_ch, input_ch_time, hidden_dim, num_layers = 16, 8, 32, 4
    skips = (1,)
    batch = 200          # not a multiple of the tile -> exercises padding

    key = jax.random.PRNGKey(0)
    kx, kt, kp = jax.random.split(key, 3)
    x = jax.random.normal(kx, (batch, input_ch), jnp.float32)
    t = jax.random.uniform(kt, (batch, input_ch_time), jnp.float32)
    params = init_params(kp, input_ch, input_ch_time, hidden_dim, num_layers,
                         skips)

    # Small tile so the demo runs a multi-step grid; real use: tile_n=4096.
    out = timenet_regression(x, t, params, tile_n=64)
    out = jax.block_until_ready(out)

    assert out.shape == (batch, 3), out.shape
    assert out.dtype == jnp.float32, out.dtype

    ref = jax.block_until_ready(reference_forward(x, t, params))
    # bf16 MXU operands with f32 accumulation: bf16-appropriate tolerance.
    np.testing.assert_allclose(np.asarray(out), np.asarray(ref),
                               rtol=2e-2, atol=2e-2)
    print("KERNEL_OK")
</pallas_src>

<mosaic_0001>
module attributes {stable_mosaic.version = 11 : i64} {
  func.func @_timenet_kernel(%arg0: i32, %arg1: memref<64x24xf32, #tpu.memory_space<vmem>>, %arg2: memref<24x32xbf16, #tpu.memory_space<vmem>>, %arg3: memref<1x32xf32, #tpu.memory_space<vmem>>, %arg4: memref<32x32xbf16, #tpu.memory_space<vmem>>, %arg5: memref<1x32xf32, #tpu.memory_space<vmem>>, %arg6: memref<16x32xbf16, #tpu.memory_space<vmem>>, %arg7: memref<32x32xbf16, #tpu.memory_space<vmem>>, %arg8: memref<1x32xf32, #tpu.memory_space<vmem>>, %arg9: memref<32x32xbf16, #tpu.memory_space<vmem>>, %arg10: memref<1x32xf32, #tpu.memory_space<vmem>>, %arg11: memref<32x3xbf16, #tpu.memory_space<vmem>>, %arg12: memref<1x3xf32, #tpu.memory_space<vmem>>, %arg13: memref<64x3xf32, #tpu.memory_space<vmem>>) attributes {dimension_semantics = [#tpu.dimension_semantics<parallel>], iteration_bounds = array<i64: 4>, scalar_prefetch = 0 : i64, scratch_operands = 0 : i64, tpu.core_type = #tpu.core_type<tc>, window_params = [{transform_indices = @transform_0, window_bounds = array<i64: 64, 24>}, {pipeline_mode = #tpu.pipeline_mode<synchronous>, transform_indices = @transform_1, window_bounds = array<i64: 24, 32>}, {pipeline_mode = #tpu.pipeline_mode<synchronous>, transform_indices = @transform_2, window_bounds = array<i64: 1, 32>}, {pipeline_mode = #tpu.pipeline_mode<synchronous>, transform_indices = @transform_3, window_bounds = array<i64: 32, 32>}, {pipeline_mode = #tpu.pipeline_mode<synchronous>, transform_indices = @transform_4, window_bounds = array<i64: 1, 32>}, {pipeline_mode = #tpu.pipeline_mode<synchronous>, transform_indices = @transform_5, window_bounds = array<i64: 16, 32>}, {pipeline_mode = #tpu.pipeline_mode<synchronous>, transform_indices = @transform_6, window_bounds = array<i64: 32, 32>}, {pipeline_mode = #tpu.pipeline_mode<synchronous>, transform_indices = @transform_7, window_bounds = array<i64: 1, 32>}, {pipeline_mode = #tpu.pipeline_mode<synchronous>, transform_indices = @transform_8, window_bounds = array<i64: 32, 32>}, {pipeline_mode = #tpu.pipeline_mode<synchronous>, transform_indices = @transform_9, window_bounds = array<i64: 1, 32>}, {pipeline_mode = #tpu.pipeline_mode<synchronous>, transform_indices = @transform_10, window_bounds = array<i64: 32, 3>}, {pipeline_mode = #tpu.pipeline_mode<synchronous>, transform_indices = @transform_11, window_bounds = array<i64: 1, 3>}, {transform_indices = @transform_12, window_bounds = array<i64: 64, 3>}]} {
    %c0 = arith.constant 0 : index
    %c0_0 = arith.constant 0 : index
    %0 = vector.load %arg1[%c0, %c0_0] : memref<64x24xf32, #tpu.memory_space<vmem>>, vector<64x24xf32>
    %1 = arith.truncf %0 : vector<64x24xf32> to vector<64x24xbf16>
    %2 = vector.extract_strided_slice %1 {offsets = [0, 0], sizes = [64, 16], strides = [1, 1]} : vector<64x24xbf16> to vector<64x16xbf16>
    %c0_1 = arith.constant 0 : index
    %c0_2 = arith.constant 0 : index
    %3 = vector.load %arg2[%c0_1, %c0_2] : memref<24x32xbf16, #tpu.memory_space<vmem>>, vector<24x32xbf16>
    %c0_3 = arith.constant 0 : index
    %c0_4 = arith.constant 0 : index
    %4 = vector.load %arg3[%c0_3, %c0_4] : memref<1x32xf32, #tpu.memory_space<vmem>>, vector<1x32xf32>
    %cst = arith.constant dense<0.000000e+00> : vector<64x32xf32>
    %5 = tpu.matmul %1, %3, %cst {dimension_numbers = #tpu.dot_dimension_numbers<[1], [0], [0], [1], [0, 0, 1, 1], [], []>} : vector<64x24xbf16>, vector<24x32xbf16>, vector<64x32xf32> -> vector<64x32xf32>
    %6 = vector.broadcast %4 : vector<1x32xf32> to vector<64x32xf32>
    %7 = arith.addf %5, %6 : vector<64x32xf32>
    %cst_5 = arith.constant 0.000000e+00 : f32
    %8 = vector.broadcast %cst_5 : f32 to vector<64x32xf32>
    %9 = arith.maximumf %7, %8 : vector<64x32xf32>
    %c0_6 = arith.constant 0 : index
    %c0_7 = arith.constant 0 : index
    %10 = vector.load %arg4[%c0_6, %c0_7] : memref<32x32xbf16, #tpu.memory_space<vmem>>, vector<32x32xbf16>
    %c0_8 = arith.constant 0 : index
    %c0_9 = arith.constant 0 : index
    %11 = vector.load %arg5[%c0_8, %c0_9] : memref<1x32xf32, #tpu.memory_space<vmem>>, vector<1x32xf32>
    %12 = arith.truncf %9 : vector<64x32xf32> to vector<64x32xbf16>
    %cst_10 = arith.constant dense<0.000000e+00> : vector<64x32xf32>
    %13 = tpu.matmul %12, %10, %cst_10 {dimension_numbers = #tpu.dot_dimension_numbers<[1], [0], [0], [1], [0, 0, 1, 1], [], []>} : vector<64x32xbf16>, vector<32x32xbf16>, vector<64x32xf32> -> vector<64x32xf32>
    %14 = vector.broadcast %11 : vector<1x32xf32> to vector<64x32xf32>
    %15 = arith.addf %13, %14 : vector<64x32xf32>
    %cst_11 = arith.constant 0.000000e+00 : f32
    %16 = vector.broadcast %cst_11 : f32 to vector<64x32xf32>
    %17 = arith.maximumf %15, %16 : vector<64x32xf32>
    %c0_12 = arith.constant 0 : index
    %c0_13 = arith.constant 0 : index
    %18 = vector.load %arg6[%c0_12, %c0_13] : memref<16x32xbf16, #tpu.memory_space<vmem>>, vector<16x32xbf16>
    %c0_14 = arith.constant 0 : index
    %c0_15 = arith.constant 0 : index
    %19 = vector.load %arg7[%c0_14, %c0_15] : memref<32x32xbf16, #tpu.memory_space<vmem>>, vector<32x32xbf16>
    %c0_16 = arith.constant 0 : index
    %c0_17 = arith.constant 0 : index
    %20 = vector.load %arg8[%c0_16, %c0_17] : memref<1x32xf32, #tpu.memory_space<vmem>>, vector<1x32xf32>
    %cst_18 = arith.constant dense<0.000000e+00> : vector<64x32xf32>
    %21 = tpu.matmul %2, %18, %cst_18 {dimension_numbers = #tpu.dot_dimension_numbers<[1], [0], [0], [1], [0, 0, 1, 1], [], []>} : vector<64x16xbf16>, vector<16x32xbf16>, vector<64x32xf32> -> vector<64x32xf32>
    %22 = arith.truncf %17 : vector<64x32xf32> to vector<64x32xbf16>
    %cst_19 = arith.constant dense<0.000000e+00> : vector<64x32xf32>
    %23 = tpu.matmul %22, %19, %cst_19 {dimension_numbers = #tpu.dot_dimension_numbers<[1], [0], [0], [1], [0, 0, 1, 1], [], []>} : vector<64x32xbf16>, vector<32x32xbf16>, vector<64x32xf32> -> vector<64x32xf32>
    %24 = arith.addf %21, %23 : vector<64x32xf32>
    %25 = vector.broadcast %20 : vector<1x32xf32> to vector<64x32xf32>
    %26 = arith.addf %24, %25 : vector<64x32xf32>
    %cst_20 = arith.constant 0.000000e+00 : f32
    %27 = vector.broadcast %cst_20 : f32 to vector<64x32xf32>
    %28 = arith.maximumf %26, %27 : vector<64x32xf32>
    %c0_21 = arith.constant 0 : index
    %c0_22 = arith.constant 0 : index
    %29 = vector.load %arg9[%c0_21, %c0_22] : memref<32x32xbf16, #tpu.memory_space<vmem>>, vector<32x32xbf16>
    %c0_23 = arith.constant 0 : index
    %c0_24 = arith.constant 0 : index
    %30 = vector.load %arg10[%c0_23, %c0_24] : memref<1x32xf32, #tpu.memory_space<vmem>>, vector<1x32xf32>
    %31 = arith.truncf %28 : vector<64x32xf32> to vector<64x32xbf16>
    %cst_25 = arith.constant dense<0.000000e+00> : vector<64x32xf32>
    %32 = tpu.matmul %31, %29, %cst_25 {dimension_numbers = #tpu.dot_dimension_numbers<[1], [0], [0], [1], [0, 0, 1, 1], [], []>} : vector<64x32xbf16>, vector<32x32xbf16>, vector<64x32xf32> -> vector<64x32xf32>
    %33 = vector.broadcast %30 : vector<1x32xf32> to vector<64x32xf32>
    %34 = arith.addf %32, %33 : vector<64x32xf32>
    %cst_26 = arith.constant 0.000000e+00 : f32
    %35 = vector.broadcast %cst_26 : f32 to vector<64x32xf32>
    %36 = arith.maximumf %34, %35 : vector<64x32xf32>
    %c0_27 = arith.constant 0 : index
    %c0_28 = arith.constant 0 : index
    %37 = vector.load %arg11[%c0_27, %c0_28] : memref<32x3xbf16, #tpu.memory_space<vmem>>, vector<32x3xbf16>
    %c0_29 = arith.constant 0 : index
    %c0_30 = arith.constant 0 : index
    %38 = vector.load %arg12[%c0_29, %c0_30] : memref<1x3xf32, #tpu.memory_space<vmem>>, vector<1x3xf32>
    %39 = arith.truncf %36 : vector<64x32xf32> to vector<64x32xbf16>
    %cst_31 = arith.constant dense<0.000000e+00> : vector<64x3xf32>
    %40 = tpu.matmul %39, %37, %cst_31 {dimension_numbers = #tpu.dot_dimension_numbers<[1], [0], [0], [1], [0, 0, 1, 1], [], []>} : vector<64x32xbf16>, vector<32x3xbf16>, vector<64x3xf32> -> vector<64x3xf32>
    %41 = vector.broadcast %38 : vector<1x3xf32> to vector<64x3xf32>
    %42 = arith.addf %40, %41 : vector<64x3xf32>
    %c0_32 = arith.constant 0 : index
    %c0_33 = arith.constant 0 : index
    %43 = vector.load %arg13[%c0_32, %c0_33] : memref<64x3xf32, #tpu.memory_space<vmem>>, vector<64x3xf32>
    tpu.vector_store %arg13[%c0_32, %c0_33], %42 {strides = array<i32>} : memref<64x3xf32, #tpu.memory_space<vmem>>, vector<64x3xf32>,
    return
  }
  func.func @transform_0(%arg0: i32) -> (i32, i32) {
    %c0_i32 = arith.constant 0 : i32
    %c0_i32_0 = arith.constant 0 : i32
    return %arg0, %c0_i32 : i32, i32
  }
  func.func @transform_1(%arg0: i32) -> (i32, i32) {
    %c0_i32 = arith.constant 0 : i32
    %c0_i32_0 = arith.constant 0 : i32
    %c0_i32_1 = arith.constant 0 : i32
    return %c0_i32, %c0_i32_0 : i32, i32
  }
  func.func @transform_2(%arg0: i32) -> (i32, i32) {
    %c0_i32 = arith.constant 0 : i32
    %c0_i32_0 = arith.constant 0 : i32
    %c0_i32_1 = arith.constant 0 : i32
    return %c0_i32, %c0_i32_0 : i32, i32
  }
  func.func @transform_3(%arg0: i32) -> (i32, i32) {
    %c0_i32 = arith.constant 0 : i32
    %c0_i32_0 = arith.constant 0 : i32
    %c0_i32_1 = arith.constant 0 : i32
    return %c0_i32, %c0_i32_0 : i32, i32
  }
  func.func @transform_4(%arg0: i32) -> (i32, i32) {
    %c0_i32 = arith.constant 0 : i32
    %c0_i32_0 = arith.constant 0 : i32
    %c0_i32_1 = arith.constant 0 : i32
    return %c0_i32, %c0_i32_0 : i32, i32
  }
  func.func @transform_5(%arg0: i32) -> (i32, i32) {
    %c0_i32 = arith.constant 0 : i32
    %c0_i32_0 = arith.constant 0 : i32
    %c0_i32_1 = arith.constant 0 : i32
    return %c0_i32, %c0_i32_0 : i32, i32
  }
  func.func @transform_6(%arg0: i32) -> (i32, i32) {
    %c0_i32 = arith.constant 0 : i32
    %c0_i32_0 = arith.constant 0 : i32
    %c0_i32_1 = arith.constant 0 : i32
    return %c0_i32, %c0_i32_0 : i32, i32
  }
  func.func @transform_7(%arg0: i32) -> (i32, i32) {
    %c0_i32 = arith.constant 0 : i32
    %c0_i32_0 = arith.constant 0 : i32
    %c0_i32_1 = arith.constant 0 : i32
    return %c0_i32, %c0_i32_0 : i32, i32
  }
  func.func @transform_8(%arg0: i32) -> (i32, i32) {
    %c0_i32 = arith.constant 0 : i32
    %c0_i32_0 = arith.constant 0 : i32
    %c0_i32_1 = arith.constant 0 : i32
    return %c0_i32, %c0_i32_0 : i32, i32
  }
  func.func @transform_9(%arg0: i32) -> (i32, i32) {
    %c0_i32 = arith.constant 0 : i32
    %c0_i32_0 = arith.constant 0 : i32
    %c0_i32_1 = arith.constant 0 : i32
    return %c0_i32, %c0_i32_0 : i32, i32
  }
  func.func @transform_10(%arg0: i32) -> (i32, i32) {
    %c0_i32 = arith.constant 0 : i32
    %c0_i32_0 = arith.constant 0 : i32
    %c0_i32_1 = arith.constant 0 : i32
    return %c0_i32, %c0_i32_0 : i32, i32
  }
  func.func @transform_11(%arg0: i32) -> (i32, i32) {
    %c0_i32 = arith.constant 0 : i32
    %c0_i32_0 = arith.constant 0 : i32
    %c0_i32_1 = arith.constant 0 : i32
    return %c0_i32, %c0_i32_0 : i32, i32
  }
  func.func @transform_12(%arg0: i32) -> (i32, i32) {
    %c0_i32 = arith.constant 0 : i32
    %c0_i32_0 = arith.constant 0 : i32
    return %arg0, %c0_i32 : i32, i32
  }
}

</mosaic_0001>

<bundles_post_ra>
// kernel: tpu_custom_call.1
= control target key start
LH: loop header
LB: loop body
LE: loop exit
PB: predicated region body
PF: predicated region fallthrough
CT: control target
= control target key end

     0   :  { %s1392_s21 = smov 0   ;;  %s1504_s0 = inlined_call_operand.vmem [shape: f32[256,24], index: 0, kind: input, shape index: {}]   ;;  %s1505_s1 = inlined_call_operand.vmem [shape: bf16[24,32], index: 1, kind: input, shape index: {}]   ;;  %s1506_s2 = inlined_call_operand.vmem [shape: f32[1,32], index: 2, kind: input, shape index: {}]   ;;  %s1507_s3 = inlined_call_operand.vmem [shape: bf16[32,32], index: 3, kind: input, shape index: {}]   ;;  %s1508_s4 = inlined_call_operand.vmem [shape: f32[1,32], index: 4, kind: input, shape index: {}]   ;;  %s1509_s5 = inlined_call_operand.vmem [shape: bf16[16,32], index: 5, kind: input, shape index: {}]   ;;  %s1510_s6 = inlined_call_operand.vmem [shape: bf16[32,32], index: 6, kind: input, shape index: {}]   ;;  %s1511_s7 = inlined_call_operand.vmem [shape: f32[1,32], index: 7, kind: input, shape index: {}]   ;;  %s1512_s8 = inlined_call_operand.vmem [shape: bf16[32,32], index: 8, kind: input, shape index: {}]   ;;  %s1513_s9 = inlined_call_operand.vmem [shape: f32[1,32], index: 9, kind: input, shape index: {}]   ;;  %s1514_s10 = inlined_call_operand.vmem [shape: bf16[32,3], index: 10, kind: input, shape index: {}]   ;;  %s1515_s11 = inlined_call_operand.vmem [shape: f32[1,3], index: 11, kind: input, shape index: {}]   ;;  %s1516_s12 = inlined_call_operand.vmem [shape: f32[256,3], index: 12, kind: output, shape index: {}]  }
   0x1 LB: > { %s1135_s22 = sadd.s32 4294967295, %s1325_s21   ;;  %p1139_p0 = scmp.ge.s32.totalorder %s1325_s21, 1  ;;  %s1325_s21 = sphi %s1392_s21, %s22_s21  }
   0x2   : > { %p363_p1 = scmp.lt.s32.totalorder %s1325_s21, 5 }
   0x4   : > { %p364_p2 = pnand %p1139_p0, %p363_p1 }
   0x5   : > { %v1308_v0 = vld [vmem:[%s1505_s1] sm:$0xff] (!%p364_p2)   ;;  %v1309_v1 = vld [vmem:[%s1505_s1 + $0x8] ss:$0 sps:$4 sm:$0xff] (!%p364_p2)   ;;  %vm462_vm0 = vcmask (!%p364_p2), 1043456   ;;  %s1140_s27 = sshll.u32 (!%p364_p2), %s1135_s22, 3  ;;  %vm449_vm1 = vcmask (!%p364_p2), 195584  }
   0x6   : > { %367 = sbr.rel (%p364_p2) target bundleno = 1150 (0x47e), region = 68  ;;  %1221 = vmatprep.subr.bf16.mxu0 (!%p364_p2), %v1308_v0  ;;  %p406_p3 = scmp.lt.s32.totalorder (!%p364_p2), %s1140_s27, 31  ;;  %v464_v2 = vsel (!%p364_p2), %vm462_vm0, %v1309_v1, 0  ;;  %v1310_v15 = vld [vmem:[%s1507_s3] sm:$0xff] (!%p364_p2)   ;;  %v1311_v16 = vld [vmem:[%s1507_s3 + $0x8] sm:$0xff] (!%p364_p2)   ;;  %vm566_vm2 = vcmask (!%p364_p2), 261120  }
   0x7   : > { %1222 = vmatpush3.bf16.msra.mxu0 (!%p364_p2), %v1308_v0  ;;  %1233 = vmatprep.subr.bf16.mxu1 (!%p364_p2), %v1310_v15  ;;  %v1312_v17 = vld [vmem:[%s1510_s6] sm:$0xff] (!%p364_p2)   ;;  %v1313_v47 = vld [vmem:[%s1510_s6 + $0x8] sm:$0xff] (!%p364_p2)   ;;  %vm758_vm3 = vcmask (!%p364_p2), 130048   ;;  %vm1070_vm4 = vcmask (!%p364_p2), 23552  }
   0x8   : > { %1299 = vmatprep.subr.msk.bf16.mxu0 (!%p364_p2), %vm462_vm0, %v1309_v1  ;;  %1234 = vmatpush3.bf16.msra.mxu1 (!%p364_p2), %v1310_v15  ;;  %v1144_v18 = vld [vmem:[%s1506_s2] ss:$0 sm:$0xff] (!%p364_p2) }
   0x9   : > { %1235 = vmatprep.subr.bf16.mxu1 (!%p364_p2), %v1311_v16  ;;  %v1314_v48 = vld [vmem:[%s1509_s5] sm:$0xff] (!%p364_p2)  }
   0xa   : > { %v1315_v49 = vld [vmem:[%s1512_s8] sm:$0xff] (!%p364_p2)  }
   0xb   : > { %1224 = vmatpush3.bf16.msra.mxu0 (!%p364_p2), %v464_v2  ;;  %v1151_v50 = vld [vmem:[%s1508_s4] ss:$0 sm:$0xff] (!%p364_p2) }
   0xc   : > { %1236 = vmatpush3.bf16.msra.mxu1 (!%p364_p2), %v1311_v16  ;;  %1245 = vmatprep.subr.bf16.mxu0 (!%p364_p2), %v1312_v17 }
   0xd   : > { %s1518_s27 = smov (!%p406_p3, %s1140_s27), 31  ;;  %1267 = vmatprep.subr.bf16.mxu1 %v1315_v49 }
   0xe   : > { %s1141_s28 = sshll.u32 %s1518_s27, 3 }
   0xf   : > { %s409_s13 = scalar_lea.vmem %s1504_s0, %s1141_s28  ;;  %s415_s14 = scalar_lea.vmem %s1516_s12, %s1141_s28 }
  0x10   : > { %v418_v3 = vld [vmem:[%s409_s13] sm:$0xff]  ;;  %v419_v4 = vld [vmem:[%s409_s13 + $0x8] sm:$0xff]  ;;  %v420_v5 = vld [vmem:[%s409_s13 + $0x10] sm:$0xff] }
  0x11   : > { %v1414_v6 = vpack.c.bf16 %v419_v4, %v418_v3  ;;  %v421_v7 = vld [vmem:[%s409_s13 + $0x18] sm:$0xff]  ;;  %v422_v8 = vld [vmem:[%s409_s13 + $0x20] sm:$0xff]  ;;  %v423_v9 = vld [vmem:[%s409_s13 + $0x28] sm:$0xff] }
  0x12   : > { %v1416_v10 = vpack.c.bf16 %v421_v7, %v420_v5  ;;  %v1418_v11 = vpack.c.bf16 %v423_v9, %v422_v8  ;;  %v424_v12 = vld [vmem:[%s409_s13 + $0x30] sm:$0xff]  ;;  %v425_v13 = vld [vmem:[%s409_s13 + $0x38] sm:$0xff] }
  0x13   : > { %1225 = vmatprep.mubr.msk.bf16.mxu0 %vm449_vm1, %v1414_v6  ;;  %v1423_v14 = vpack.c.bf16 %v425_v13, %v424_v12 }
  0x14   : > { %1226 = vmatmul.mubr.msk.bf16.vlgmr.msra.gmra.mrb[0].mxu0 %vm449_vm1, %v1416_v10 }
  0x15   : > { %1229 = vmatprep.mubr.msk.bf16.mxu0 %vm449_vm1, %v1418_v11  ;;  %1246 = vmatpush3.bf16.msra.mxu0 %v1312_v17 }
  0x16   : > { %1247 = vmatprep.subr.bf16.mxu0 %v1313_v47 }
  0x19   : > { %1248 = vmatpush3.bf16.msra.mxu0 %v1313_v47  ;;  %v1170_v47 = vld [vmem:[%s1513_s9] ss:$0 sm:$0xff] }
  0x1a   : > { %1257 = vmatprep.subr.bf16.mxu0 %v1314_v48 }
  0x1c   : > { %1230 = vmatmul.mubr.msk.bf16.gmra.mrb[4].mxu0 %vm449_vm1, %v1423_v14 }
  0xe7   : > { %v1227_v19 = vpop.f32.mrb[0].mxu0 }
  0xe8   : > { %v509_v20 = vadd.f32 %v1227_v19, %v1144_v18  ;;  %v500_v21 = vpop.f32.mrb[1].mxu0  ;;  %v1316_v19 = vld [vmem:[%s1512_s8 + $0x8] sm:$0xff]  }
  0xe9   : > { %v501_v22 = vadd.f32 %v1144_v18, %v500_v21  ;;  %v1228_v23 = vpop.f32.mrb[2].mxu0 }
  0xea   : > { %v512_v24 = vadd.f32 %v1228_v23, %v1144_v18  ;;  %v503_v25 = vpop.f32.mrb[3].mxu0  ;;  %v533_v27 = vmax.f32 %v509_v20, 0.0  ;;  %v1317_v20 = vld [vmem:[%s1514_s10] sm:$0xff]  }
  0xeb   : > { %v504_v26 = vadd.f32 %v1144_v18, %v503_v25  ;;  %v531_v29 = vmax.f32 %v501_v22, 0.0 }
  0xec   : > { %v534_v28 = vmax.f32 %v512_v24, 0.0 }
  0xed   : > { %v532_v30 = vmax.f32 %v504_v26, 0.0 }
  0xee   : > { %v545_v31 = vpack.c.bf16 %v534_v28, %v533_v27 }
  0xef   : > { %v1231_v32 = vpop.f32.mrb[4].mxu0  ;;  %v544_v33 = vpack.c.bf16 %v532_v30, %v531_v29 }
  0xf0   : > { %v525_v34 = vadd.f32 %v1231_v32, %v1144_v18  ;;  %v516_v35 = vpop.f32.mrb[5].mxu0 }
  0xf1   : > { %v517_v36 = vadd.f32 %v1144_v18, %v516_v35  ;;  %v1232_v37 = vpop.f32.mrb[6].mxu0  ;;  %1237 = vmatprep.mubr.msk.bf16.mxu1 %vm566_vm2, %v544_v33 }
  0xf2   : > { %v528_v38 = vadd.f32 %v1232_v37, %v1144_v18  ;;  %v519_v39 = vpop.f32.mrb[7].mxu0  ;;  %1238 = vmatmul.mubr.msk.bf16.vlgmr.msra.gmra.mrb[0].mxu1 %vm566_vm2, %v545_v31  ;;  %v537_v41 = vmax.f32 %v525_v34, 0.0 }
  0xf3   : > { %v520_v40 = vadd.f32 %v1144_v18, %v519_v39  ;;  %v535_v43 = vmax.f32 %v517_v36, 0.0  ;;  %1268 = vmatpush3.bf16.msra.mxu1 %v1315_v49 }
  0xf4   : > { %v538_v42 = vmax.f32 %v528_v38, 0.0  ;;  %1269 = vmatprep.subr.bf16.mxu1 %v1316_v19 }
  0xf5   : > { %v536_v44 = vmax.f32 %v520_v40, 0.0 }
  0xf6   : > { %v547_v45 = vpack.c.bf16 %v538_v42, %v537_v41 }
  0xf7   : > { %v546_v46 = vpack.c.bf16 %v536_v44, %v535_v43  ;;  %1270 = vmatpush3.bf16.msra.mxu1 %v1316_v19 }
  0xf8   : > { %1279 = vmatprep.subr.bf16.mxu1 %v1317_v20 }
  0xf9   : > { %1241 = vmatprep.mubr.msk.bf16.mxu1 %vm566_vm2, %v546_v46  ;;  %v1318_v46 = vld [vmem:[%s1514_s10 + $0x8] sm:$0xff]  }
  0xfa   : > { %1242 = vmatmul.mubr.msk.bf16.gmra.mrb[4].mxu1 %vm566_vm2, %v547_v45 }
 0x1c5   : > { %v1239_v51 = vpop.f32.mrb[0].mxu1 }
 0x1c6   : > { %v622_v52 = vadd.f32 %v1239_v51, %v1151_v50  ;;  %v613_v53 = vpop.f32.mrb[1].mxu1 }
 0x1c7   : > { %v614_v54 = vadd.f32 %v1151_v50, %v613_v53  ;;  %v1240_v55 = vpop.f32.mrb[2].mxu1 }
 0x1c8   : > { %v625_v56 = vadd.f32 %v1240_v55, %v1151_v50  ;;  %v616_v57 = vpop.f32.mrb[3].mxu1  ;;  %v646_v59 = vmax.f32 %v622_v52, 0.0 }
 0x1c9   : > { %v617_v58 = vadd.f32 %v1151_v50, %v616_v57  ;;  %v644_v61 = vmax.f32 %v614_v54, 0.0 }
 0x1ca   : > { %v647_v60 = vmax.f32 %v625_v56, 0.0 }
 0x1cb   : > { %v645_v62 = vmax.f32 %v617_v58, 0.0 }
 0x1cc   : > { %v660_v63 = vpack.c.bf16 %v647_v60, %v646_v59 }
 0x1cd   : > { %v659_v0 = vpack.c.bf16 %v645_v62, %v644_v61  ;;  %v1243_v1 = vpop.f32.mrb[4].mxu1 }
 0x1ce   : > { %v638_v2 = vadd.f32 %v1243_v1, %v1151_v50  ;;  %v629_v3 = vpop.f32.mrb[5].mxu1 }
 0x1cf   : > { %v630_v4 = vadd.f32 %v1151_v50, %v629_v3  ;;  %v1244_v5 = vpop.f32.mrb[6].mxu1  ;;  %1249 = vmatprep.mubr.msk.bf16.mxu0 %vm566_vm2, %v659_v0 }
 0x1d0   : > { %v641_v7 = vadd.f32 %v1244_v5, %v1151_v50  ;;  %v632_v8 = vpop.f32.mrb[7].mxu1  ;;  %1250 = vmatmul.mubr.msk.bf16.vlgmr.msra.gmra.mrb[8].mxu0 %vm566_vm2, %v660_v63  ;;  %v650_v12 = vmax.f32 %v638_v2, 0.0 }
 0x1d1   : > { %v633_v9 = vadd.f32 %v1151_v50, %v632_v8  ;;  %1258 = vmatpush3.bf16.msra.mxu0 %v1314_v48  ;;  %v648_v15 = vmax.f32 %v630_v4, 0.0 }
 0x1d2   : > { %v651_v13 = vmax.f32 %v641_v7, 0.0 }
 0x1d3   : > { %v649_v16 = vmax.f32 %v633_v9, 0.0 }
 0x1d4   : > { %v662_v17 = vpack.c.bf16 %v651_v13, %v650_v12 }
 0x1d5   : > { %v661_v18 = vpack.c.bf16 %v649_v16, %v648_v15  ;;  %v1177_v16 = vld [vmem:[%s1515_s11] ss:$0 sm:$0xff] }
 0x1d7   : > { %1253 = vmatprep.mubr.msk.bf16.mxu0 %vm566_vm2, %v661_v18 }
 0x1d8   : > { %1254 = vmatmul.mubr.msk.bf16.gmra.mrb[12].mxu0 %vm566_vm2, %v662_v17 }
 0x1d9   : > { %1259 = vmatprep.mubr.msk.bf16.mxu0 %vm758_vm3, %v1414_v6  ;;  %v1169_v6 = vld [vmem:[%s1511_s7] ss:$0 sm:$0xff] }
 0x1e0   : > { %1260 = vmatmul.mubr.msk.bf16.vlgmr.msra.gmra.mrb[8].mxu0 %vm758_vm3, %v1416_v10 }
 0x1e1   : > { %1263 = vmatprep.mubr.msk.bf16.mxu0 %vm758_vm3, %v1418_v11 }
 0x1e8   : > { %1264 = vmatmul.mubr.msk.bf16.gmra.mrb[12].mxu0 %vm758_vm3, %v1423_v14 }
 0x2b3   : > { %v1261_v10 = vpop.f32.mrb[8].mxu0 }
 0x2b4   : > { %v840_v21 = vadd.f32 %v1261_v10, %v1169_v6  ;;  %v801_v11 = vpop.f32.mrb[9].mxu0 }
 0x2b5   : > { %v838_v22 = vadd.f32 %v1169_v6, %v801_v11  ;;  %v1262_v14 = vpop.f32.mrb[10].mxu0 }
 0x2b6   : > { %v841_v23 = vadd.f32 %v1262_v14, %v1169_v6  ;;  %v804_v24 = vpop.f32.mrb[11].mxu0  ;;  %v848_v26 = vmax.f32 %v840_v21, 0.0 }
 0x2b7   : > { %v839_v25 = vadd.f32 %v1169_v6, %v804_v24  ;;  %v846_v28 = vmax.f32 %v838_v22, 0.0 }
 0x2b8   : > { %v849_v27 = vmax.f32 %v841_v23, 0.0 }
 0x2b9   : > { %v847_v29 = vmax.f32 %v839_v25, 0.0 }
 0x2ba   : > { %v860_v30 = vpack.c.bf16 %v849_v27, %v848_v26 }
 0x2bb   : > { %v859_v31 = vpack.c.bf16 %v847_v29, %v846_v28  ;;  %v1265_v32 = vpop.f32.mrb[12].mxu0 }
 0x2bc   : > { %v844_v33 = vadd.f32 %v1265_v32, %v1169_v6  ;;  %v817_v34 = vpop.f32.mrb[13].mxu0 }
 0x2bd   : > { %v842_v35 = vadd.f32 %v1169_v6, %v817_v34  ;;  %v1266_v36 = vpop.f32.mrb[14].mxu0  ;;  %1271 = vmatprep.mubr.msk.bf16.mxu1 %vm566_vm2, %v859_v31 }
 0x2be   : > { %v845_v37 = vadd.f32 %v1266_v36, %v1169_v6  ;;  %v820_v38 = vpop.f32.mrb[15].mxu0  ;;  %1272 = vmatmul.mubr.msk.bf16.vlgmr.msra.gmra.mrb[8].mxu1 %vm566_vm2, %v860_v30  ;;  %v852_v40 = vmax.f32 %v844_v33, 0.0 }
 0x2bf   : > { %v843_v39 = vadd.f32 %v1169_v6, %v820_v38  ;;  %1280 = vmatpush3.bf16.msra.mxu1 %v1317_v20  ;;  %v850_v42 = vmax.f32 %v842_v35, 0.0 }
 0x2c0   : > { %v853_v41 = vmax.f32 %v845_v37, 0.0  ;;  %1281 = vmatprep.subr.bf16.mxu1 %v1318_v46 }
 0x2c1   : > { %v851_v43 = vmax.f32 %v843_v39, 0.0 }
 0x2c2   : > { %v862_v44 = vpack.c.bf16 %v853_v41, %v852_v40 }
 0x2c3   : > { %v861_v45 = vpack.c.bf16 %v851_v43, %v850_v42  ;;  %1282 = vmatpush3.bf16.msra.mxu1 %v1318_v46 }
 0x2c5   : > { %1275 = vmatprep.mubr.msk.bf16.mxu1 %vm566_vm2, %v861_v45 }
 0x2c6   : > { %1276 = vmatmul.mubr.msk.bf16.gmra.mrb[12].mxu1 %vm566_vm2, %v862_v44 }
 0x391   : > { %v1273_v48 = vpop.f32.mrb[8].mxu1 }
 0x392   : > { %v936_v49 = vadd.f32 %v1273_v48, %v1170_v47  ;;  %v927_v50 = vpop.f32.mrb[9].mxu1 }
 0x393   : > { %v928_v51 = vadd.f32 %v1170_v47, %v927_v50  ;;  %v1274_v52 = vpop.f32.mrb[10].mxu1 }
 0x394   : > { %v939_v53 = vadd.f32 %v1274_v52, %v1170_v47  ;;  %v930_v54 = vpop.f32.mrb[11].mxu1  ;;  %v960_v56 = vmax.f32 %v936_v49, 0.0 }
 0x395   : > { %v931_v55 = vadd.f32 %v1170_v47, %v930_v54  ;;  %v958_v58 = vmax.f32 %v928_v51, 0.0 }
 0x396   : > { %v961_v57 = vmax.f32 %v939_v53, 0.0 }
 0x397   : > { %v959_v59 = vmax.f32 %v931_v55, 0.0 }
 0x398   : > { %v972_v60 = vpack.c.bf16 %v961_v57, %v960_v56 }
 0x399   : > { %v971_v61 = vpack.c.bf16 %v959_v59, %v958_v58  ;;  %v1277_v62 = vpop.f32.mrb[12].mxu1 }
 0x39a   : > { %v952_v63 = vadd.f32 %v1277_v62, %v1170_v47  ;;  %v943_v0 = vpop.f32.mrb[13].mxu1 }
 0x39b   : > { %v944_v1 = vadd.f32 %v1170_v47, %v943_v0  ;;  %v1278_v2 = vpop.f32.mrb[14].mxu1  ;;  %1283 = vmatprep.mubr.msk.bf16.mxu1 %vm566_vm2, %v971_v61 }
 0x39c   : > { %v955_v3 = vadd.f32 %v1278_v2, %v1170_v47  ;;  %v946_v4 = vpop.f32.mrb[15].mxu1  ;;  %1284 = vmatmul.mubr.msk.bf16.vlgmr.msra.gmra.mrb[16].mxu1 %vm566_vm2, %v972_v60  ;;  %v964_v7 = vmax.f32 %v952_v63, 0.0 }
 0x39d   : > { %v947_v5 = vadd.f32 %v1170_v47, %v946_v4  ;;  %v962_v9 = vmax.f32 %v944_v1, 0.0 }
 0x39e   : > { %v965_v8 = vmax.f32 %v955_v3, 0.0 }
 0x39f   : > { %v963_v12 = vmax.f32 %v947_v5, 0.0 }
 0x3a0   : > { %v974_v13 = vpack.c.bf16 %v965_v8, %v964_v7 }
 0x3a1   : > { %v973_v15 = vpack.c.bf16 %v963_v12, %v962_v9 }
 0x3a3   : > { %1287 = vmatprep.mubr.msk.bf16.mxu1 %vm566_vm2, %v973_v15 }
 0x3a4   : > { %1288 = vmatmul.mubr.msk.bf16.gmra.mrb[20].mxu1 %vm566_vm2, %v974_v13 }
 0x46f   : > { %v1285_v17 = vpop.f32.mrb[16].mxu1 }
 0x470   : > { %v1048_v18 = vadd.f32 %v1285_v17, %v1177_v16  ;;  %v1039_v19 = vpop.f32.mrb[17].mxu1 }
 0x471   : > { %v1040_v20 = vadd.f32 %v1177_v16, %v1039_v19  ;;  %v1286_v6 = vpop.f32.mrb[18].mxu1 }
 0x472   : > { %1073 = vst.msk [vmem:[%s415_s14 + $0x10] sm:$0xff] %vm1070_vm4, %v1048_v18  ;;  %v1051_v10 = vadd.f32 %v1286_v6, %v1177_v16  ;;  %v1042_v21 = vpop.f32.mrb[19].mxu1 }
 0x473   : > { %1071 = vst.msk [vmem:[%s415_s14] sm:$0xff] %vm1070_vm4, %v1040_v20  ;;  %v1043_v11 = vadd.f32 %v1177_v16, %v1042_v21 }
 0x474   : > { %1074 = vst.msk [vmem:[%s415_s14 + $0x18] sm:$0xff] %vm1070_vm4, %v1051_v10 }
 0x475   : > { %1072 = vst.msk [vmem:[%s415_s14 + $0x8] sm:$0xff] %vm1070_vm4, %v1043_v11 }
 0x477   : > { %v1289_v22 = vpop.f32.mrb[20].mxu1 }
 0x478   : > { %v1064_v14 = vadd.f32 %v1289_v22, %v1177_v16  ;;  %v1055_v23 = vpop.f32.mrb[21].mxu1 }
 0x479   : > { %v1056_v24 = vadd.f32 %v1177_v16, %v1055_v23  ;;  %v1290_v25 = vpop.f32.mrb[22].mxu1 }
 0x47a   : > { %1077 = vst.msk [vmem:[%s415_s14 + $0x30] sm:$0xff] %vm1070_vm4, %v1064_v14  ;;  %v1067_v26 = vadd.f32 %v1290_v25, %v1177_v16  ;;  %v1058_v27 = vpop.f32.mrb[23].mxu1 }
 0x47b   : > { %1075 = vst.msk [vmem:[%s415_s14 + $0x20] sm:$0xff] %vm1070_vm4, %v1056_v24  ;;  %v1059_v28 = vadd.f32 %v1177_v16, %v1058_v27 }
 0x47c   : > { %1078 = vst.msk [vmem:[%s415_s14 + $0x38] sm:$0xff] %vm1070_vm4, %v1067_v26 }
 0x47d   : > { %1076 = vst.msk [vmem:[%s415_s14 + $0x28] sm:$0xff] %vm1070_vm4, %v1059_v28 }
 0x47e PF: > { %s22_s21 = sadd.s32 1, %s1325_s21  }
 0x47f   : > { %p19_p4 = scmp.ge.s32.totalorder %s22_s21, 6  }
 0x481   :  { %21 = sbr.rel (!%p19_p4) target bundleno = 1 (0x1), region = 98 }

</bundles_post_ra>
